<compile_context>
chip_gen: v6e
topology: v6e:2x2x1
jax: 0.10.0
libtpu: 0.0.40
codegen_flags: <defaults>
</compile_context>

<pallas_src>
import functools

import jax
import jax.numpy as jnp
from jax.experimental import pallas as pl
from jax.experimental.pallas import tpu as pltpu

LANE = 128


def _round_up(x, m):
    return ((x + m - 1) // m) * m


def _vmem_capacity():
    try:
        return int(pltpu.get_tpu_info().vmem_capacity_bytes)
    except Exception:
        return 64 * 1024 * 1024   # conservative (v7x-sized) fallback


def _choose_tiling(n, block=None):
    """Returns (n_padded, tile). tile is used for both row and column blocking of adj."""
    vmem = _vmem_capacity()
    if block is None:
        # 128-MiB parts (v5e/v6e) take big tiles; 64-MiB (v7x) a bit smaller.
        block = 1024 if vmem >= 96 * 1024 * 1024 else 512
    n32 = _round_up(max(n, 1), 32)          # int8 adjacency prefers >=32 sublanes
    if n32 <= block:
        return n32, n32                     # single (1, 1) grid block (full-dim blocks)
    t = _round_up(block, LANE)              # multi-tile blocks must be lane/sublane aligned
    return _round_up(n, t), t


def _prepare_graph(adj, n_p):
    """Pad + cast adjacency to int8 and precompute 1/deg.  Cache this if the graph is reused."""
    n = adj.shape[0]
    adj_i8 = jnp.zeros((n_p, n_p), jnp.int8).at[:n, :n].set(adj.astype(jnp.int8))
    deg = jnp.sum(adj, axis=1, keepdims=True)                       # exact f32
    inv = jnp.where(deg > 0.0, 1.0 / deg, 0.0)
    inv_p = jnp.zeros((n_p, 1), jnp.float32).at[:n, :].set(inv)
    return adj_i8, inv_p


# ---------------- Pass 1: SAGEConv(F0 -> F1, mean) + ReLU, plus hp = h1 @ Wn2 -------------------
def _layer1_kernel(adj_ref, xk_ref, invdeg_ref, xi_ref, ws1_ref, wn1_ref, b1_ref, wn2_ref,
                   h1_ref, hp_ref, acc_ref):
    k = pl.program_id(1)

    @pl.when(k == 0)
    def _():
        acc_ref[...] = jnp.zeros_like(acc_ref)

    # int8 adjacency tile -> bf16 (lossless for {0,1}); bf16 x bf16 MXU matmul, f32 accumulate.
    a = adj_ref[...].astype(jnp.bfloat16)                               # (TM, TK)
    acc_ref[...] += jnp.dot(a, xk_ref[...], preferred_element_type=jnp.float32)

    @pl.when(k == pl.num_programs(1) - 1)
    def _():
        neigh = acc_ref[...] * invdeg_ref[...]                          # (TM, F0P) f32
        x_self = xi_ref[...].astype(jnp.float32)
        h1 = (jnp.dot(x_self, ws1_ref[...], preferred_element_type=jnp.float32)
              + jnp.dot(neigh, wn1_ref[...], preferred_element_type=jnp.float32)
              + b1_ref[...])
        h1 = jnp.maximum(h1, 0.0)                                       # ReLU
        # dropout(p=0.5) in inference mode -> identity
        h1_ref[...] = h1.astype(h1_ref.dtype)
        # pre-projection for layer 2's reordered aggregation A @ (h1 @ Wn2)
        hp_ref[...] = jnp.dot(h1, wn2_ref[...],
                              preferred_element_type=jnp.float32).astype(hp_ref.dtype)


# ---------------- Pass 2: SAGEConv(F1 -> F2, mean) + log_softmax --------------------------------
def _layer2_kernel(adj_ref, hpk_ref, invdeg_ref, h1i_ref, ws2_ref, b2_ref,
                   out_ref, acc_ref, *, out_feats):
    k = pl.program_id(1)

    @pl.when(k == 0)
    def _():
        acc_ref[...] = jnp.zeros_like(acc_ref)

    a = adj_ref[...].astype(jnp.bfloat16)                               # (TM, TK)
    acc_ref[...] += jnp.dot(a, hpk_ref[...], preferred_element_type=jnp.float32)

    @pl.when(k == pl.num_programs(1) - 1)
    def _():
        # ((A @ h1) * inv_deg) @ Wn2 == (A @ (h1 @ Wn2)) * inv_deg   (row scaling commutes)
        neigh = acc_ref[...] * invdeg_ref[...]                          # (TM, F2P) f32
        h1 = h1i_ref[...].astype(jnp.float32)
        h2 = (jnp.dot(h1, ws2_ref[...], preferred_element_type=jnp.float32)
              + neigh + b2_ref[...])

        # mask lane padding so log_softmax only sees the real classes
        lane = jax.lax.broadcasted_iota(jnp.int32, h2.shape, 1)
        h2 = jnp.where(lane < out_feats, h2, jnp.float32(-1e30))

        m = jnp.max(h2, axis=1, keepdims=True)
        z = h2 - m
        lse = jnp.log(jnp.sum(jnp.exp(z), axis=1, keepdims=True))
        out_ref[...] = z - lse


def gsgnet_forward(adj, feat, params, *, block=None):
    N, in_feats = feat.shape
    hidden = params["ws1"].shape[1]
    out_feats = params["ws2"].shape[1]

    f0p = _round_up(in_feats, LANE)
    f1p = _round_up(hidden, LANE)
    f2p = _round_up(out_feats, LANE)

    n_p, t = _choose_tiling(N, block)
    grid = (n_p // t, n_p // t)

    # NOTE: hoist/cache _prepare_graph(...) (and the feature padding) when the same graph
    # is reused across forward calls — it is an O(N^2) HBM round trip per invocation.
    adj_p, inv_deg = _prepare_graph(adj, n_p)
    x_p = jnp.zeros((n_p, f0p), jnp.bfloat16).at[:N, :in_feats].set(feat.astype(jnp.bfloat16))

    def pad2(w, r, c):
        return jnp.zeros((r, c), jnp.float32).at[:w.shape[0], :w.shape[1]].set(w)

    ws1 = pad2(params["ws1"], f0p, f1p)
    wn1 = pad2(params["wn1"], f0p, f1p)
    b1 = pad2(params["b1"], 1, f1p)
    ws2 = pad2(params["ws2"], f1p, f2p)
    wn2 = pad2(params["wn2"], f1p, f2p)
    b2 = pad2(params["b2"], 1, f2p)

    vmem = _vmem_capacity()
    cparams = pltpu.CompilerParams(
        dimension_semantics=("parallel", "arbitrary"),     # rows across cores, k is a reduction
        vmem_limit_bytes=min(vmem * 3 // 4, 112 * 1024 * 1024),
    )

    adj_spec = pl.BlockSpec((t, t), lambda i, k: (i, k))

    def row_spec(cols):                                    # depends only on the row tile i
        return pl.BlockSpec((t, cols), lambda i, k: (i, 0))

    def col_spec(cols):                                    # streamed per adjacency-column tile k
        return pl.BlockSpec((t, cols), lambda i, k: (k, 0))

    def const_spec(rows, cols):                            # tiny resident weights: single-buffer
        return pl.BlockSpec((rows, cols), lambda i, k: (0, 0), pipeline_mode=pl.Buffered(1))

    # ---- pass 1: layer 1 + ReLU; emits h1 (bf16) and hp = h1 @ Wn2 (bf16) for every node ----
    h1, hp = pl.pallas_call(
        _layer1_kernel,
        grid=grid,
        in_specs=[
            adj_spec,                  # adj tile (int8, streamed)
            col_spec(f0p),             # X[k]     (bf16, aggregation operand)
            row_spec(1),               # 1/deg[i] (f32, precomputed)
            row_spec(f0p),             # X[i]     (bf16, self term)
            const_spec(f0p, f1p),      # Ws1
            const_spec(f0p, f1p),      # Wn1
            const_spec(1, f1p),        # b1
            const_spec(f1p, f2p),      # Wn2 (pre-projection)
        ],
        out_specs=[row_spec(f1p), row_spec(f2p)],
        out_shape=[jax.ShapeDtypeStruct((n_p, f1p), jnp.bfloat16),
                   jax.ShapeDtypeStruct((n_p, f2p), jnp.bfloat16)],
        scratch_shapes=[pltpu.VMEM((t, f0p), jnp.float32)],
        compiler_params=cparams,
    )(adj_p, x_p, inv_deg, x_p, ws1, wn1, b1, wn2)

    # ---- pass 2: layer 2 + log_softmax ----
    out = pl.pallas_call(
        functools.partial(_layer2_kernel, out_feats=out_feats),
        grid=grid,
        in_specs=[
            adj_spec,                  # adj tile (int8, streamed)
            col_spec(f2p),             # hp[k]    (bf16, aggregation operand)
            row_spec(1),               # 1/deg[i]
            row_spec(f1p),             # h1[i]    (bf16, self term)
            const_spec(f1p, f2p),      # Ws2
            const_spec(1, f2p),        # b2
        ],
        out_specs=row_spec(f2p),
        out_shape=jax.ShapeDtypeStruct((n_p, f2p), jnp.float32),
        scratch_shapes=[pltpu.VMEM((t, f2p), jnp.float32)],
        compiler_params=cparams,
    )(adj_p, hp, inv_deg, h1, ws2, b2)

    return out[:N, :out_feats]


def init_params(key, in_feats=26, hidden=40, out_feats=24):
    ks = jax.random.split(key, 4)

    def glorot(k, shape):
        fan_in, fan_out = shape
        lim = (6.0 / (fan_in + fan_out)) ** 0.5
        return jax.random.uniform(k, shape, jnp.float32, -lim, lim)

    return {
        "ws1": glorot(ks[0], (in_feats, hidden)),
        "wn1": glorot(ks[1], (in_feats, hidden)),
        "b1": jnp.zeros((1, hidden), jnp.float32),
        "ws2": glorot(ks[2], (hidden, out_feats)),
        "wn2": glorot(ks[3], (hidden, out_feats)),
        "b2": jnp.zeros((1, out_feats), jnp.float32),
    }


def reference_forward(adj, feat, params):
    deg = jnp.sum(adj, axis=1, keepdims=True)
    inv_deg = jnp.where(deg > 0, 1.0 / deg, 0.0)
    neigh1 = (adj @ feat) * inv_deg
    h1 = jnp.maximum(feat @ params["ws1"] + neigh1 @ params["wn1"] + params["b1"], 0.0)
    neigh2 = (adj @ h1) * inv_deg
    h2 = h1 @ params["ws2"] + neigh2 @ params["wn2"] + params["b2"]
    return jax.nn.log_softmax(h2, axis=1)


def _make_graph(key, n, in_feats):
    k_adj, k_feat = jax.random.split(key)
    adj = jax.random.bernoulli(k_adj, p=0.3, shape=(n, n)).astype(jnp.float32)
    adj = adj * (1.0 - jnp.eye(n, dtype=jnp.float32))   # no self-loops, some isolated nodes
    feat = jax.random.normal(k_feat, (n, in_feats), jnp.float32)
    return adj, feat


if __name__ == "__main__":
    key = jax.random.PRNGKey(0)
    k_graph, k_graph2, k_param = jax.random.split(key, 3)

    IN_FEATS, HIDDEN, OUT_FEATS = 26, 40, 24
    params = init_params(k_param, in_feats=IN_FEATS, hidden=HIDDEN, out_feats=OUT_FEATS)

    # Activations travel as bf16 per the perf review (adjacency & degrees stay exact),
    # so we validate against the f32 reference at a bf16-appropriate tolerance.
    TOL = 2e-2

    # case 1: tiny graph -> single (1, 1) grid block
    adj, feat = _make_graph(k_graph, 16, IN_FEATS)
    out = jax.block_until_ready(gsgnet_forward(adj, feat, params))
    ref = reference_forward(adj, feat, params)
    assert out.shape == (16, OUT_FEATS)
    err = float(jnp.max(jnp.abs(out - ref)))
    assert err < TOL, f"case1 max abs err {err}"

    # case 2: multi-tile 3x3 grid (N=320, tile=128) exercising k-accumulation + padding
    adj2, feat2 = _make_graph(k_graph2, 320, IN_FEATS)
    out2 = jax.block_until_ready(gsgnet_forward(adj2, feat2, params, block=128))
    ref2 = reference_forward(adj2, feat2, params)
    assert out2.shape == (320, OUT_FEATS)
    err2 = float(jnp.max(jnp.abs(out2 - ref2)))
    assert err2 < TOL, f"case2 max abs err {err2}"

    print("KERNEL_OK")
</pallas_src>

<mosaic_0001>
module attributes {stable_mosaic.version = 11 : i64} {
  func.func @_layer1_kernel(%arg0: i32, %arg1: i32, %arg2: memref<32x32xi8, #tpu.memory_space<vmem>>, %arg3: memref<32x128xbf16, #tpu.memory_space<vmem>>, %arg4: memref<32x1xf32, #tpu.memory_space<vmem>>, %arg5: memref<32x128xbf16, #tpu.memory_space<vmem>>, %arg6: memref<128x128xf32, #tpu.memory_space<vmem>>, %arg7: memref<128x128xf32, #tpu.memory_space<vmem>>, %arg8: memref<1x128xf32, #tpu.memory_space<vmem>>, %arg9: memref<128x128xf32, #tpu.memory_space<vmem>>, %arg10: memref<32x128xbf16, #tpu.memory_space<vmem>>, %arg11: memref<32x128xbf16, #tpu.memory_space<vmem>>, %arg12: memref<32x128xf32, #tpu.memory_space<vmem>>) attributes {dimension_semantics = [#tpu.dimension_semantics<parallel>, #tpu.dimension_semantics<arbitrary>], iteration_bounds = array<i64: 1, 1>, scalar_prefetch = 0 : i64, scratch_operands = 1 : i64, tpu.core_type = #tpu.core_type<tc>, window_params = [{transform_indices = @transform_0, window_bounds = array<i64: 32, 32>}, {transform_indices = @transform_1, window_bounds = array<i64: 32, 128>}, {transform_indices = @transform_2, window_bounds = array<i64: 32, 1>}, {transform_indices = @transform_3, window_bounds = array<i64: 32, 128>}, {pipeline_mode = #tpu.pipeline_mode<synchronous>, transform_indices = @transform_4, window_bounds = array<i64: 128, 128>}, {pipeline_mode = #tpu.pipeline_mode<synchronous>, transform_indices = @transform_5, window_bounds = array<i64: 128, 128>}, {pipeline_mode = #tpu.pipeline_mode<synchronous>, transform_indices = @transform_6, window_bounds = array<i64: 1, 128>}, {pipeline_mode = #tpu.pipeline_mode<synchronous>, transform_indices = @transform_7, window_bounds = array<i64: 128, 128>}, {transform_indices = @transform_8, window_bounds = array<i64: 32, 128>}, {transform_indices = @transform_9, window_bounds = array<i64: 32, 128>}]} {
    %c0_i32 = arith.constant 0 : i32
    %0 = arith.cmpi eq, %arg1, %c0_i32 : i32
    %1 = arith.extui %0 : i1 to i32
    %c0_i32_0 = arith.constant 0 : i32
    %2 = arith.cmpi ne, %1, %c0_i32_0 : i32
    scf.if %2 {
      %cst_10 = arith.constant 0.000000e+00 : f32
      %13 = vector.broadcast %cst_10 : f32 to vector<32x128xf32>
      %c0_11 = arith.constant 0 : index
      %c0_12 = arith.constant 0 : index
      %14 = vector.load %arg12[%c0_11, %c0_12] : memref<32x128xf32, #tpu.memory_space<vmem>>, vector<32x128xf32>
      tpu.vector_store %arg12[%c0_11, %c0_12], %13 {strides = array<i32>} : memref<32x128xf32, #tpu.memory_space<vmem>>, vector<32x128xf32>,
    } else {
    }
    %c0 = arith.constant 0 : index
    %c0_1 = arith.constant 0 : index
    %3 = vector.load %arg2[%c0, %c0_1] : memref<32x32xi8, #tpu.memory_space<vmem>>, vector<32x32xi8>
    %4 = arith.sitofp %3 : vector<32x32xi8> to vector<32x32xbf16>
    %c0_2 = arith.constant 0 : index
    %c0_3 = arith.constant 0 : index
    %5 = vector.load %arg12[%c0_2, %c0_3] : memref<32x128xf32, #tpu.memory_space<vmem>>, vector<32x128xf32>
    %c0_4 = arith.constant 0 : index
    %c0_5 = arith.constant 0 : index
    %6 = vector.load %arg3[%c0_4, %c0_5] : memref<32x128xbf16, #tpu.memory_space<vmem>>, vector<32x128xbf16>
    %cst = arith.constant dense<0.000000e+00> : vector<32x128xf32>
    %7 = tpu.matmul %4, %6, %cst {dimension_numbers = #tpu.dot_dimension_numbers<[1], [0], [0], [1], [0, 0, 1, 1], [], []>} : vector<32x32xbf16>, vector<32x128xbf16>, vector<32x128xf32> -> vector<32x128xf32>
    %8 = arith.addf %5, %7 : vector<32x128xf32>
    %c0_6 = arith.constant 0 : index
    %c0_7 = arith.constant 0 : index
    %9 = vector.load %arg12[%c0_6, %c0_7] : memref<32x128xf32, #tpu.memory_space<vmem>>, vector<32x128xf32>
    tpu.vector_store %arg12[%c0_6, %c0_7], %8 {strides = array<i32>} : memref<32x128xf32, #tpu.memory_space<vmem>>, vector<32x128xf32>,
    %c0_i32_8 = arith.constant 0 : i32
    %10 = arith.cmpi eq, %arg1, %c0_i32_8 : i32
    %11 = arith.extui %10 : i1 to i32
    %c0_i32_9 = arith.constant 0 : i32
    %12 = arith.cmpi ne, %11, %c0_i32_9 : i32
    scf.if %12 {
      %c0_10 = arith.constant 0 : index
      %c0_11 = arith.constant 0 : index
      %13 = vector.load %arg12[%c0_10, %c0_11] : memref<32x128xf32, #tpu.memory_space<vmem>>, vector<32x128xf32>
      %c0_12 = arith.constant 0 : index
      %c0_13 = arith.constant 0 : index
      %14 = vector.load %arg4[%c0_12, %c0_13] : memref<32x1xf32, #tpu.memory_space<vmem>>, vector<32x1xf32>
      %15 = vector.broadcast %14 : vector<32x1xf32> to vector<32x128xf32>
      %16 = arith.mulf %13, %15 : vector<32x128xf32>
      %c0_14 = arith.constant 0 : index
      %c0_15 = arith.constant 0 : index
      %17 = vector.load %arg5[%c0_14, %c0_15] : memref<32x128xbf16, #tpu.memory_space<vmem>>, vector<32x128xbf16>
      %18 = arith.extf %17 : vector<32x128xbf16> to vector<32x128xf32>
      %c0_16 = arith.constant 0 : index
      %c0_17 = arith.constant 0 : index
      %19 = vector.load %arg6[%c0_16, %c0_17] : memref<128x128xf32, #tpu.memory_space<vmem>>, vector<128x128xf32>
      %cst_18 = arith.constant dense<0.000000e+00> : vector<32x128xf32>
      %20 = tpu.matmul %18, %19, %cst_18 {dimension_numbers = #tpu.dot_dimension_numbers<[1], [0], [0], [1], [0, 0, 1, 1], [], []>} : vector<32x128xf32>, vector<128x128xf32>, vector<32x128xf32> -> vector<32x128xf32>
      %c0_19 = arith.constant 0 : index
      %c0_20 = arith.constant 0 : index
      %21 = vector.load %arg7[%c0_19, %c0_20] : memref<128x128xf32, #tpu.memory_space<vmem>>, vector<128x128xf32>
      %cst_21 = arith.constant dense<0.000000e+00> : vector<32x128xf32>
      %22 = tpu.matmul %16, %21, %cst_21 {dimension_numbers = #tpu.dot_dimension_numbers<[1], [0], [0], [1], [0, 0, 1, 1], [], []>} : vector<32x128xf32>, vector<128x128xf32>, vector<32x128xf32> -> vector<32x128xf32>
      %23 = arith.addf %20, %22 : vector<32x128xf32>
      %c0_22 = arith.constant 0 : index
      %c0_23 = arith.constant 0 : index
      %24 = vector.load %arg8[%c0_22, %c0_23] : memref<1x128xf32, #tpu.memory_space<vmem>>, vector<1x128xf32>
      %25 = vector.broadcast %24 : vector<1x128xf32> to vector<32x128xf32>
      %26 = arith.addf %23, %25 : vector<32x128xf32>
      %cst_24 = arith.constant 0.000000e+00 : f32
      %27 = vector.broadcast %cst_24 : f32 to vector<32x128xf32>
      %28 = arith.maximumf %26, %27 : vector<32x128xf32>
      %29 = arith.truncf %28 : vector<32x128xf32> to vector<32x128xbf16>
      %c0_25 = arith.constant 0 : index
      %c0_26 = arith.constant 0 : index
      %30 = vector.load %arg10[%c0_25, %c0_26] : memref<32x128xbf16, #tpu.memory_space<vmem>>, vector<32x128xbf16>
      tpu.vector_store %arg10[%c0_25, %c0_26], %29 {strides = array<i32>} : memref<32x128xbf16, #tpu.memory_space<vmem>>, vector<32x128xbf16>,
      %c0_27 = arith.constant 0 : index
      %c0_28 = arith.constant 0 : index
      %31 = vector.load %arg9[%c0_27, %c0_28] : memref<128x128xf32, #tpu.memory_space<vmem>>, vector<128x128xf32>
      %cst_29 = arith.constant dense<0.000000e+00> : vector<32x128xf32>
      %32 = tpu.matmul %28, %31, %cst_29 {dimension_numbers = #tpu.dot_dimension_numbers<[1], [0], [0], [1], [0, 0, 1, 1], [], []>} : vector<32x128xf32>, vector<128x128xf32>, vector<32x128xf32> -> vector<32x128xf32>
      %33 = arith.truncf %32 : vector<32x128xf32> to vector<32x128xbf16>
      %c0_30 = arith.constant 0 : index
      %c0_31 = arith.constant 0 : index
      %34 = vector.load %arg11[%c0_30, %c0_31] : memref<32x128xbf16, #tpu.memory_space<vmem>>, vector<32x128xbf16>
      tpu.vector_store %arg11[%c0_30, %c0_31], %33 {strides = array<i32>} : memref<32x128xbf16, #tpu.memory_space<vmem>>, vector<32x128xbf16>,
    } else {
    }
    return
  }
  func.func @transform_0(%arg0: i32, %arg1: i32) -> (i32, i32) {
    %c0_i32 = arith.constant 0 : i32
    return %arg0, %arg1 : i32, i32
  }
  func.func @transform_1(%arg0: i32, %arg1: i32) -> (i32, i32) {
    %c0_i32 = arith.constant 0 : i32
    %c0_i32_0 = arith.constant 0 : i32
    return %arg1, %c0_i32 : i32, i32
  }
  func.func @transform_2(%arg0: i32, %arg1: i32) -> (i32, i32) {
    %c0_i32 = arith.constant 0 : i32
    %c0_i32_0 = arith.constant 0 : i32
    return %arg0, %c0_i32 : i32, i32
  }
  func.func @transform_3(%arg0: i32, %arg1: i32) -> (i32, i32) {
    %c0_i32 = arith.constant 0 : i32
    %c0_i32_0 = arith.constant 0 : i32
    return %arg0, %c0_i32 : i32, i32
  }
  func.func @transform_4(%arg0: i32, %arg1: i32) -> (i32, i32) {
    %c0_i32 = arith.constant 0 : i32
    %c0_i32_0 = arith.constant 0 : i32
    %c0_i32_1 = arith.constant 0 : i32
    return %c0_i32, %c0_i32_0 : i32, i32
  }
  func.func @transform_5(%arg0: i32, %arg1: i32) -> (i32, i32) {
    %c0_i32 = arith.constant 0 : i32
    %c0_i32_0 = arith.constant 0 : i32
    %c0_i32_1 = arith.constant 0 : i32
    return %c0_i32, %c0_i32_0 : i32, i32
  }
  func.func @transform_6(%arg0: i32, %arg1: i32) -> (i32, i32) {
    %c0_i32 = arith.constant 0 : i32
    %c0_i32_0 = arith.constant 0 : i32
    %c0_i32_1 = arith.constant 0 : i32
    return %c0_i32, %c0_i32_0 : i32, i32
  }
  func.func @transform_7(%arg0: i32, %arg1: i32) -> (i32, i32) {
    %c0_i32 = arith.constant 0 : i32
    %c0_i32_0 = arith.constant 0 : i32
    %c0_i32_1 = arith.constant 0 : i32
    return %c0_i32, %c0_i32_0 : i32, i32
  }
  func.func @transform_8(%arg0: i32, %arg1: i32) -> (i32, i32) {
    %c0_i32 = arith.constant 0 : i32
    %c0_i32_0 = arith.constant 0 : i32
    return %arg0, %c0_i32 : i32, i32
  }
  func.func @transform_9(%arg0: i32, %arg1: i32) -> (i32, i32) {
    %c0_i32 = arith.constant 0 : i32
    %c0_i32_0 = arith.constant 0 : i32
    return %arg0, %c0_i32 : i32, i32
  }
}

</mosaic_0001>

<bundles_post_ra>
// kernel: tpu_custom_call.1
= control target key start
LH: loop header
LB: loop body
LE: loop exit
PB: predicated region body
PF: predicated region fallthrough
CT: control target
= control target key end

     0   :  { %15 = vsyncpa [#allocation4], 0  ;;  %s1118_s0 = inlined_call_operand.hbm [shape: s8[32,32], index: 0, kind: input, shape index: {}]   ;;  %s1119_s1 = inlined_call_operand.vmem [shape: bf16[32,128], index: 1, kind: input, shape index: {}]   ;;  %s1120_s2 = inlined_call_operand.vmem [shape: f32[32,1], index: 2, kind: input, shape index: {}]   ;;  %s1121_s3 = inlined_call_operand.vmem [shape: bf16[32,128], index: 3, kind: input, shape index: {}]   ;;  %s1122_s4 = inlined_call_operand.hbm [shape: f32[128,128], index: 4, kind: input, shape index: {}]   ;;  %s1123_s5 = inlined_call_operand.hbm [shape: f32[128,128], index: 5, kind: input, shape index: {}]   ;;  %s1124_s6 = inlined_call_operand.vmem [shape: f32[1,128], index: 6, kind: input, shape index: {}]   ;;  %s1125_s7 = inlined_call_operand.hbm [shape: f32[128,128], index: 7, kind: input, shape index: {}]   ;;  %s1126_s8 = inlined_call_operand.hbm [shape: bf16[32,128], index: 8, kind: output, shape index: {0}]   ;;  %s1127_s9 = inlined_call_operand.hbm [shape: bf16[32,128], index: 9, kind: output, shape index: {1}]  }
   0x1   :  { %16 = vsyncpa [#allocation7], 0 }
   0x2   :  { %17 = vsyncpa [#allocation10], 0 }
   0x3   :  { %18 = vsyncpa [#allocation5], 0 }
   0x4   :  { %19 = vsyncpa [#allocation13], 0  ;;  %s1001_s30 = smov [#allocation6]  }
   0x5   :  { %s41_s10 = sshll.u32 %s1001_s30, 4  ;;  %s42_s10 = int_to_ptr.vmem [resolvable:$true] %s41_s10 }
   0x6   :  { %s879_s11 = scalar_lea.vmem %s42_s10, 2048  ;;  %p884_p1 = scmp.lt.s32.totalorder %s42_s10, %s42_s10 }
   0x7   :  { %p880_p0 = scmp.ne.s32.totalorder %s42_s10, %s879_s11  ;;  %p885_p2 = scmp.lt.s32.totalorder %s879_s11, %s879_s11 }
   0x9   :  { %p886_p3 = por %p885_p2, %p884_p1 }
   0xb   :  { %p887_p4 = pnand %p886_p3, %p880_p0 }
   0xd   :  { %890 = shalt.err (!%p887_p4)
}
   0xe   :  { %s1002_s12 = smov 128   ;;  %s1003_s13 = smov 8  }
   0xf   :  { %47 = dma.hbm_to_vmem [thread:$0]  %s1122_s4, 2048, %s42_s10, [#allocation7], %s1002_s12, %s1002_s12, %s1003_s13  }
  0x10   :  { %s1004_s16 = smov [#allocation3]   ;;  %s1005_s18 = smov [#allocation8]  }
  0x11   :  { %s26_s17 = sshll.u32 %s1004_s16, 4  ;;  %s53_s19 = sshll.u32 %s1005_s18, 4  ;;  %s27_s17 = int_to_ptr.vmem [resolvable:$true] %s26_s17  ;;  %s54_s19 = int_to_ptr.vmem [resolvable:$true] %s53_s19 }
  0x12   :  { %s899_s20 = scalar_lea.vmem %s27_s17, 128  ;;  %p904_p6 = scmp.lt.s32.totalorder %s27_s17, %s27_s17 }
  0x13   :  { %p900_p5 = scmp.ne.s32.totalorder %s27_s17, %s899_s20  ;;  %p905_p7 = scmp.lt.s32.totalorder %s899_s20, %s899_s20 }
  0x15   :  { %p906_p8 = por %p905_p7, %p904_p6 }
  0x17   :  { %p907_p9 = pnand %p906_p8, %p900_p5 }
  0x19   :  { %910 = shalt.err (!%p907_p9)
}
  0x1a   :  { %29 = dma.hbm_to_vmem [thread:$0]  %s1118_s0, 128, %s27_s17, [#allocation4]  }
  0x1b   :  { %s919_s23 = scalar_lea.vmem %s54_s19, 2048  ;;  %p924_p11 = scmp.lt.s32.totalorder %s54_s19, %s54_s19 }
  0x1c   :  { %p920_p10 = scmp.ne.s32.totalorder %s54_s19, %s919_s23  ;;  %p925_p12 = scmp.lt.s32.totalorder %s919_s23, %s919_s23 }
  0x1e   :  { %p926_p13 = por %p925_p12, %p924_p11 }
  0x20   :  { %p927_p0 = pnand %p926_p13, %p920_p10 }
  0x22   :  { %930 = shalt.err (!%p927_p0)
}
  0x23   :  { %59 = dma.hbm_to_vmem [thread:$0]  %s1123_s5, 2048, %s54_s19, [#allocation7], %s1002_s12, %s1002_s12, %s1003_s13  }
  0x24   :  { %s1006_s25 = smov [#allocation9]  }
  0x25   :  { %s67_s26 = sshll.u32 %s1006_s25, 4  ;;  %s68_s26 = int_to_ptr.vmem [resolvable:$true] %s67_s26 }
  0x26   :  { %s939_s27 = scalar_lea.vmem %s68_s26, 2048  ;;  %p944_p2 = scmp.lt.s32.totalorder %s68_s26, %s68_s26 }
  0x27   :  { %p940_p1 = scmp.ne.s32.totalorder %s68_s26, %s939_s27  ;;  %p945_p3 = scmp.lt.s32.totalorder %s939_s27, %s939_s27 }
  0x29   :  { %p946_p4 = por %p945_p3, %p944_p2 }
  0x2b   :  { %p947_p5 = pnand %p946_p4, %p940_p1 }
  0x2d   :  { %950 = shalt.err (!%p947_p5)
}
  0x2e   :  { %73 = dma.hbm_to_vmem [thread:$0]  %s1125_s7, 2048, %s68_s26, [#allocation10], %s1002_s12, %s1002_s12, %s1003_s13  }
  0x2f   :  { %991 = dma.done.wait [#allocation4], 128  }
  0x30   :  { %992 = vsyncadd [#allocation4], 4294967168 }
  0x31   :  { %993 = dma.done.wait [#allocation7], 4096  }
  0x32   :  { %994 = vsyncadd [#allocation7], 4294963200 }
  0x33   :  { %995 = dma.done.wait [#allocation10], 2048  }
  0x34   :  { %996 = vsyncadd [#allocation10], 4294965248  ;;  %v1007_v0 = vmov 0   ;;  %v869_v1 = vld [vmem:[%s1119_s1 + $0x8] sm:$0xff]   ;;  %v870_v2 = vld [vmem:[%s1119_s1] sm:$0xff]   ;;  %vm118_vm0 = vcmask 261120  }
  0x35   :  { %867 = vset.pattern.permute.xlu0 %v1007_v0  ;;  %868 = vset.pattern.permute.xlu1 %v1007_v0  ;;  %v95_v3 = vld [vmem:[#allocation3] sm:$0xff]  ;;  %v191_v5 = vld [vmem:[%s1120_s2 + $0x10] sm:$0xff]  ;;  %v190_v7 = vld [vmem:[%s1120_s2 + $0x8] sm:$0xff] }
  0x36   :  { %734 = vmatprep.subr.bf16.mxu0 %v869_v1  ;;  %v189_v4 = vld [vmem:[%s1120_s2] sm:$0xff]  ;;  %v96_v6 = vunpack.c.l.s8.bf16 %v95_v3  ;;  %205 = vperm.xlu1 %868, %v191_v5   ;;  %v192_v9 = vld [vmem:[%s1120_s2 + $0x18] sm:$0xff]  ;;  %v97_v11 = vunpack.c.h.s8.bf16 %v95_v3  ;;  %v254_v13 = vld [vmem:[#allocation8 + $0x68] sm:$0xff] }
  0x37   :  { %735 = vmatpush3.bf16.msra.mxu0 %v869_v1  ;;  %195 = vperm.xlu0 %867, %v189_v4   ;;  %v256_v8 = vld [vmem:[#allocation8 + $0x78] sm:$0xff]  ;;  %v255_v12 = vld [vmem:[#allocation8 + $0x70] sm:$0xff]  ;;  %v253_v15 = vld [vmem:[#allocation8 + $0x60] sm:$0xff] }
  0x38   :  { %736 = vmatprep.subr.bf16.mxu0 %v870_v2  ;;  %738 = vmatprep.mubr.msk.bf16.mxu0 %vm118_vm0, %v96_v6  ;;  %v240_v10 = vld [vmem:[#allocation6 + $0x78] sm:$0xff]  ;;  %v239_v14 = vld [vmem:[#allocation6 + $0x70] sm:$0xff]  ;;  %v238_v16 = vld [vmem:[#allocation6 + $0x68] sm:$0xff] }
  0x39   :  { %742 = vmatprep.subr.mxu1 %v256_v8  ;;  %v252_v17 = vld [vmem:[#allocation8 + $0x58] sm:$0xff]  ;;  %v237_v18 = vld [vmem:[#allocation6 + $0x60] sm:$0xff]  ;;  %v251_v19 = vld [vmem:[#allocation8 + $0x50] sm:$0xff] }
  0x3a   :  { %743 = vmatpush3.msra.mxu1 %v256_v8  ;;  %210 = vperm.xlu1 %868, %v192_v9   ;;  %v236_v20 = vld [vmem:[#allocation6 + $0x58] sm:$0xff]  ;;  %v250_v21 = vld [vmem:[#allocation8 + $0x48] sm:$0xff]  ;;  %v235_v22 = vld [vmem:[#allocation6 + $0x50] sm:$0xff] }
  0x3b   :  { %737 = vmatpush3.bf16.msra.mxu0 %v870_v2  ;;  %200 = vperm.xlu0 %867, %v190_v7   ;;  %v249_v23 = vld [vmem:[#allocation8 + $0x40] sm:$0xff]  ;;  %v234_v24 = vld [vmem:[#allocation6 + $0x48] sm:$0xff]  ;;  %v248_v25 = vld [vmem:[#allocation8 + $0x38] sm:$0xff] }
  0x3c   :  { %780 = vmatprep.subr.mxu0 %v240_v10  ;;  %744 = vmatprep.subr.mxu1 %v255_v12  ;;  %v233_v26 = vld [vmem:[#allocation6 + $0x40] sm:$0xff]  ;;  %v247_v27 = vld [vmem:[#allocation8 + $0x30] sm:$0xff]  ;;  %v232_v28 = vld [vmem:[#allocation6 + $0x38] sm:$0xff] }
  0x3d   :  { %745 = vmatpush3.msra.mxu1 %v255_v12  ;;  %v246_v29 = vld [vmem:[#allocation8 + $0x28] sm:$0xff]  ;;  %v231_v30 = vld [vmem:[#allocation6 + $0x30] sm:$0xff]  ;;  %v245_v31 = vld [vmem:[#allocation8 + $0x20] sm:$0xff] }
  0x3e   :  { %739 = vmatmul.mubr.msk.bf16.vlgmr.msra.gmra.mxu0 %vm118_vm0, %v97_v11  ;;  %746 = vmatprep.subr.mxu1 %v254_v13  ;;  %v230_v32 = vld [vmem:[#allocation6 + $0x28] sm:$0xff]  ;;  %v229_v33 = vld [vmem:[#allocation6 + $0x20] sm:$0xff]  ;;  %v228_v34 = vld [vmem:[#allocation6 + $0x18] sm:$0xff] }
  0x3f   :  { %781 = vmatpush3.msra.mxu0 %v240_v10  ;;  %747 = vmatpush3.msra.mxu1 %v254_v13  ;;  %v244_v35 = vld [vmem:[#allocation8 + $0x18] sm:$0xff]  ;;  %v227_v36 = vld [vmem:[#allocation6 + $0x10] sm:$0xff]  ;;  %v226_v38 = vld [vmem:[#allocation6 + $0x8] sm:$0xff] }
  0x40   :  { %782 = vmatprep.subr.mxu0 %v239_v14  ;;  %748 = vmatprep.subr.mxu1 %v253_v15  ;;  %v243_v37 = vld [vmem:[#allocation8 + $0x10] sm:$0xff]  ;;  %v640_v39 = vld [vmem:[%s1121_s3] sm:$0xff]   ;;  %v242_v40 = vld [vmem:[#allocation8 + $0x8] sm:$0xff] }
  0x41   :  { %783 = vmatpush3.msra.mxu0 %v239_v14  ;;  %749 = vmatpush3.msra.mxu1 %v253_v15  ;;  %v225_v41 = vld [vmem:[#allocation6] sm:$0xff]  ;;  %v641_v42 = vunpack.c.l.bf16 %v640_v39  ;;  %v642_v43 = vunpack.c.h.bf16 %v640_v39  ;;  %v477_v48 = vld [vmem:[#allocation9 + $0x78] sm:$0xff]  ;;  %v476_v60 = vld [vmem:[#allocation9 + $0x70] sm:$0xff] }
  0x42   :  { %784 = vmatprep.subr.mxu0 %v238_v16  ;;  %750 = vmatprep.subr.mxu1 %v252_v17  ;;  %v241_v44 = vld [vmem:[#allocation8] sm:$0xff]  ;;  %v475_v61 = vld [vmem:[#allocation9 + $0x68] sm:$0xff]  ;;  %v473_v0 = vld [vmem:[#allocation9 + $0x58] sm:$0xff] }
  0x43   :  { %785 = vmatpush3.msra.mxu0 %v238_v16  ;;  %751 = vmatpush3.msra.mxu1 %v252_v17  ;;  %v667_v45 = vld [vmem:[%s1121_s3 + $0x8] sm:$0xff]   ;;  %v472_v1 = vld [vmem:[#allocation9 + $0x50] sm:$0xff]  ;;  %v471_v2 = vld [vmem:[#allocation9 + $0x48] sm:$0xff] }
  0x44   :  { %786 = vmatprep.subr.mxu0 %v237_v18  ;;  %752 = vmatprep.subr.mxu1 %v251_v19  ;;  %v645_v46 = vunpack.c.l.bf16 %v667_v45  ;;  %v646_v47 = vunpack.c.h.bf16 %v667_v45  ;;  %v474_v63 = vld [vmem:[#allocation9 + $0x60] sm:$0xff]  ;;  %v469_v4 = vld [vmem:[#allocation9 + $0x38] sm:$0xff]  ;;  %v468_v5 = vld [vmem:[#allocation9 + $0x30] sm:$0xff] }
  0x45   :  { %787 = vmatpush3.msra.mxu0 %v237_v18  ;;  %753 = vmatpush3.msra.mxu1 %v251_v19  ;;  %v470_v3 = vld [vmem:[#allocation9 + $0x40] sm:$0xff]  ;;  %v467_v6 = vld [vmem:[#allocation9 + $0x28] sm:$0xff]  ;;  %v465_v8 = vld [vmem:[#allocation9 + $0x18] sm:$0xff] }
  0x46   :  { %788 = vmatprep.subr.mxu0 %v236_v20  ;;  %754 = vmatprep.subr.mxu1 %v250_v21  ;;  %v466_v7 = vld [vmem:[#allocation9 + $0x20] sm:$0xff]  ;;  %v464_v9 = vld [vmem:[#allocation9 + $0x10] sm:$0xff]  ;;  %v463_v10 = vld [vmem:[#allocation9 + $0x8] sm:$0xff] }
  0x47   :  { %789 = vmatpush3.msra.mxu0 %v236_v20  ;;  %755 = vmatpush3.msra.mxu1 %v250_v21  ;;  %v462_v11 = vld [vmem:[#allocation9] sm:$0xff]  ;;  %v622_v15 = vld [vmem:[%s1124_s6] ss:$0 sm:$0xff]  ;;  %s1008_s6 = smov [#allocation11]  }
  0x48   :  { %790 = vmatprep.subr.mxu0 %v235_v22  ;;  %756 = vmatprep.subr.mxu1 %v249_v23  ;;  %s588_s21 = sshll.u32 %s1008_s6, 4  ;;  %s589_s21 = int_to_ptr.vmem [resolvable:$true] %s588_s21 }
  0x49   :  { %791 = vmatpush3.msra.mxu0 %v235_v22  ;;  %757 = vmatpush3.msra.mxu1 %v249_v23  ;;  %s951_s22 = scalar_lea.vmem %s589_s21, 256  ;;  %p956_p7 = scmp.lt.s32.totalorder %s589_s21, %s589_s21 }
  0x4a   :  { %792 = vmatprep.subr.mxu0 %v234_v24  ;;  %758 = vmatprep.subr.mxu1 %v248_v25  ;;  %p952_p6 = scmp.ne.s32.totalorder %s589_s21, %s951_s22  ;;  %p957_p8 = scmp.lt.s32.totalorder %s951_s22, %s951_s22 }
  0x4b   :  { %793 = vmatpush3.msra.mxu0 %v234_v24  ;;  %759 = vmatpush3.msra.mxu1 %v248_v25 }
  0x4c   :  { %794 = vmatprep.subr.mxu0 %v233_v26  ;;  %760 = vmatprep.subr.mxu1 %v247_v27  ;;  %p958_p9 = por %p957_p8, %p956_p7 }
  0x4d   :  { %795 = vmatpush3.msra.mxu0 %v233_v26  ;;  %761 = vmatpush3.msra.mxu1 %v247_v27 }
  0x4e   :  { %796 = vmatprep.subr.mxu0 %v232_v28  ;;  %762 = vmatprep.subr.mxu1 %v246_v29  ;;  %p959_p10 = pnand %p958_p9, %p952_p6 }
  0x4f   :  { %797 = vmatpush3.msra.mxu0 %v232_v28  ;;  %763 = vmatpush3.msra.mxu1 %v246_v29 }
  0x50   :  { %798 = vmatprep.subr.mxu0 %v231_v30  ;;  %764 = vmatprep.subr.mxu1 %v245_v31 }
  0x51   :  { %799 = vmatpush3.msra.mxu0 %v231_v30  ;;  %765 = vmatpush3.msra.mxu1 %v245_v31 }
  0x52   :  { %800 = vmatprep.subr.mxu0 %v230_v32  ;;  %766 = vmatprep.subr.mxu1 %v244_v35 }
  0x53   :  { %801 = vmatpush3.msra.mxu0 %v230_v32  ;;  %767 = vmatpush3.msra.mxu1 %v244_v35 }
  0x54   :  { %802 = vmatprep.subr.mxu0 %v229_v33  ;;  %768 = vmatprep.subr.mxu1 %v243_v37 }
  0x55   :  { %803 = vmatpush3.msra.mxu0 %v229_v33  ;;  %769 = vmatpush3.msra.mxu1 %v243_v37 }
  0x56   :  { %804 = vmatprep.subr.mxu0 %v228_v34  ;;  %770 = vmatprep.subr.mxu1 %v242_v40 }
  0x57   :  { %805 = vmatpush3.msra.mxu0 %v228_v34  ;;  %771 = vmatpush3.msra.mxu1 %v242_v40 }
  0x58   :  { %806 = vmatprep.subr.mxu0 %v227_v36  ;;  %812 = vmatprep.mubr.f32.mxu0 %v641_v42 }
  0x59   :  { %807 = vmatpush3.msra.mxu0 %v227_v36  ;;  %772 = vmatprep.subr.mxu1 %v241_v44 }
  0x5a   :  { %808 = vmatprep.subr.mxu0 %v226_v38  ;;  %773 = vmatpush3.msra.mxu1 %v241_v44 }
  0x5b   :  { %809 = vmatpush3.msra.mxu0 %v226_v38  ;;  %818 = vmatprep.subr.mxu1 %v477_v48 }
  0x5c   :  { %810 = vmatprep.subr.mxu0 %v225_v41 }
  0x5d   :  { %811 = vmatpush3.msra.mxu0 %v225_v41 }
  0x5e   :  { %813 = vmatmul.mubr.f32.vlgmr.msra.gmra.mxu0 %v642_v43 }
  0x5f   :  { %815 = vmatprep.mubr.f32.mxu0 %v645_v46 }
  0x62   :  { %816 = vmatmul.mubr.f32.gmra.mxu0 %v646_v47 }
  0xb1   :  { %v206_v51 = vpop.permute.xlu1 %205 }
  0xb2   :  { %v196_v49 = vpop.permute.xlu0 %195 }
  0xb5   :  { %v211_v59 = vpop.permute.xlu1 %210 }
  0xb6   :  { %v201_v55 = vpop.permute.xlu0 %200 }
  0xfe   :  { %v740_v50 = vpop.f32.mrf.mxu0 }
  0xff   :  { %v215_v58 = vmul.f32 %v740_v50, %v206_v51 }
 0x100   :  { %v159_v52 = vpop.f32.mrf.mxu0 }
 0x101   :  { %v213_v53 = vmul.f32 %v196_v49, %v159_v52 }
 0x102   :  { %v741_v54 = vpop.f32.mrf.mxu0 }
 0x103   :  { %774 = vmatprep.mubr.f32.mxu1 %v213_v53  ;;  %v216_v62 = vmul.f32 %v741_v54, %v211_v59 }
 0x104   :  { %v162_v56 = vpop.f32.mrf.mxu0 }
 0x105   :  { %v214_v57 = vmul.f32 %v201_v55, %v162_v56 }
 0x107   :  { %775 = vmatmul.mubr.f32.vlgmr.msra.gmra.mxu1 %v214_v57 }
 0x108   :  { %777 = vmatprep.mubr.f32.mxu1 %v215_v58  ;;  %819 = vmatpush3.msra.mxu1 %v477_v48 }
 0x109   :  { %820 = vmatprep.subr.mxu1 %v476_v60 }
 0x10a   :  { %821 = vmatpush3.msra.mxu1 %v476_v60 }
 0x10b   :  { %778 = vmatmul.mubr.f32.gmra.mxu1 %v216_v62  ;;  %822 = vmatprep.subr.mxu1 %v475_v61 }
 0x10c   :  { %823 = vmatpush3.msra.mxu1 %v475_v61 }
 0x10d   :  { %824 = vmatprep.subr.mxu1 %v474_v63 }
 0x10e   :  { %825 = vmatpush3.msra.mxu1 %v474_v63 }
 0x10f   :  { %826 = vmatprep.subr.mxu1 %v473_v0 }
 0x110   :  { %827 = vmatpush3.msra.mxu1 %v473_v0 }
 0x111   :  { %828 = vmatprep.subr.mxu1 %v472_v1 }
 0x112   :  { %829 = vmatpush3.msra.mxu1 %v472_v1 }
 0x113   :  { %830 = vmatprep.subr.mxu1 %v471_v2 }
 0x114   :  { %831 = vmatpush3.msra.mxu1 %v471_v2 }
 0x115   :  { %832 = vmatprep.subr.mxu1 %v470_v3 }
 0x116   :  { %833 = vmatpush3.msra.mxu1 %v470_v3 }
 0x117   :  { %834 = vmatprep.subr.mxu1 %v469_v4 }
 0x118   :  { %835 = vmatpush3.msra.mxu1 %v469_v4 }
 0x119   :  { %836 = vmatprep.subr.mxu1 %v468_v5 }
 0x11a   :  { %837 = vmatpush3.msra.mxu1 %v468_v5 }
 0x11b   :  { %838 = vmatprep.subr.mxu1 %v467_v6 }
 0x11c   :  { %839 = vmatpush3.msra.mxu1 %v467_v6 }
 0x11d   :  { %840 = vmatprep.subr.mxu1 %v466_v7 }
 0x11e   :  { %841 = vmatpush3.msra.mxu1 %v466_v7  ;;  %v814_v12 = vpop.f32.mrf.mxu0 }
 0x11f   :  { %842 = vmatprep.subr.mxu1 %v465_v8 }
 0x120   :  { %843 = vmatpush3.msra.mxu1 %v465_v8  ;;  %v408_v13 = vpop.f32.mrf.mxu0 }
 0x121   :  { %844 = vmatprep.subr.mxu1 %v464_v9 }
 0x122   :  { %845 = vmatpush3.msra.mxu1 %v464_v9  ;;  %v817_v18 = vpop.f32.mrf.mxu0 }
 0x123   :  { %846 = vmatprep.subr.mxu1 %v463_v10 }
 0x124   :  { %847 = vmatpush3.msra.mxu1 %v463_v10  ;;  %v418_v24 = vpop.f32.mrf.mxu0 }
 0x125   :  { %848 = vmatprep.subr.mxu1 %v462_v11 }
 0x126   :  { %849 = vmatpush3.msra.mxu1 %v462_v11 }
 0x1c7   :  { %v776_v14 = vpop.f32.mrf.mxu1 }
 0x1c8   :  { %v414_v16 = vadd.f32 %v814_v12, %v776_v14 }
 0x1c9   :  { %v323_v17 = vpop.f32.mrf.mxu1 }
 0x1ca   :  { %v435_v19 = vadd.f32 %v622_v15, %v414_v16  ;;  %v409_v20 = vadd.f32 %v408_v13, %v323_v17 }
 0x1cb   :  { %v779_v21 = vpop.f32.mrf.mxu1 }
 0x1cc   :  { %v434_v22 = vadd.f32 %v622_v15, %v409_v20  ;;  %v424_v23 = vadd.f32 %v817_v18, %v779_v21  ;;  %v439_v26 = vmax.f32 %v435_v19, 0.0 }
 0x1cd   :  { %v333_v25 = vpop.f32.mrf.mxu1 }
 0x1ce   :  { %v438_v27 = vmax.f32 %v434_v22, 0.0  ;;  %v437_v28 = vadd.f32 %v622_v15, %v424_v23  ;;  %v419_v29 = vadd.f32 %v418_v24, %v333_v25 }
 0x1d0   :  { %v650_v30 = vpack.c.bf16 %v439_v26, %v438_v27  ;;  %v436_v31 = vadd.f32 %v622_v15, %v419_v29  ;;  %850 = vmatprep.mubr.f32.mxu1 %v438_v27  ;;  %v441_v32 = vmax.f32 %v437_v28, 0.0 }
 0x1d1   :  { %851 = vmatmul.mubr.f32.vlgmr.msra.gmra.mxu1 %v439_v26 }
 0x1d2   :  { %651 = vst [vmem:[#allocation11] sm:$0xff] %v650_v30   ;;  %v440_v33 = vmax.f32 %v436_v31, 0.0 }
 0x1d4   :  { %v655_v34 = vpack.c.bf16 %v441_v32, %v440_v33  ;;  %853 = vmatprep.mubr.f32.mxu1 %v440_v33 }
 0x1d5   :  { %854 = vmatmul.mubr.f32.gmra.mxu1 %v441_v32 }
 0x1d6   :  { %668 = vst [vmem:[#allocation11 + $0x8] sm:$0xff] %v655_v34  }
 0x1d7   :  { %962 = shalt.err (!%p959_p10)
}
 0x1d8   :  { %s1009_s23 = smov 64   ;;  %s1010_s4 = smov 4  }
 0x1d9   :  { %594 = dma.vmem_to_hbm [thread:$0]  %s589_s21, 256, %s1126_s8, [#allocation5], %s1009_s23, %s1009_s23, %s1010_s4  }
 0x1da   :  { %s1011_s26 = smov [#allocation12]  }
 0x1db   :  { %s600_s27 = sshll.u32 %s1011_s26, 4  ;;  %s601_s27 = int_to_ptr.vmem [resolvable:$true] %s600_s27 }
 0x1dc   :  { %s971_s0 = scalar_lea.vmem %s601_s27, 256  ;;  %p976_p12 = scmp.lt.s32.totalorder %s601_s27, %s601_s27 }
 0x1dd   :  { %p972_p11 = scmp.ne.s32.totalorder %s601_s27, %s971_s0  ;;  %p977_p13 = scmp.lt.s32.totalorder %s971_s0, %s971_s0 }
 0x1df   :  { %p978_p0 = por %p977_p13, %p976_p12 }
 0x1e1   :  { %p979_p1 = pnand %p978_p0, %p972_p11 }
 0x291   :  { %v852_v35 = vpop.f32.mrf.mxu1 }
 0x293   :  { %v544_v36 = vpop.f32.mrf.mxu1 }
 0x294   :  { %v660_v37 = vpack.c.bf16 %v852_v35, %v544_v36 }
 0x295   :  { %v855_v38 = vpop.f32.mrf.mxu1 }
 0x296   :  { %661 = vst [vmem:[#allocation12] sm:$0xff] %v660_v37  }
 0x297   :  { %v554_v39 = vpop.f32.mrf.mxu1 }
 0x298   :  { %v665_v40 = vpack.c.bf16 %v855_v38, %v554_v39 }
 0x29a   :  { %669 = vst [vmem:[#allocation12 + $0x8] sm:$0xff] %v665_v40  }
 0x29b   :  { %982 = shalt.err (!%p979_p1)
}
 0x29c   :  { %606 = dma.vmem_to_hbm [thread:$0]  %s601_s27, 256, %s1127_s9, [#allocation13], %s1009_s23, %s1009_s23, %s1010_s4  }
 0x29d   :  { %997 = dma.done.wait [#allocation5], 256  }
 0x29e   :  { %998 = vsyncadd [#allocation5], 4294967040 }
 0x29f   :  { %999 = dma.done.wait [#allocation13], 256  }
 0x2a0   :  { %1000 = vsyncadd [#allocation13], 4294967040 }
 0x2a1   :  { %613 = vsyncpa [#allocation4], 1 }
 0x2a2   :  { %614 = vsyncpa [#allocation7], 1 }
 0x2a3   :  { %615 = vsyncpa [#allocation10], 1 }
 0x2a4   :  { %616 = vsyncpa [#allocation5], 1 }
 0x2a5   :  { %617 = vsyncpa [#allocation13], 1 }

</bundles_post_ra>
